<compile_context>
chip_gen: v6e
topology: v6e:2x2x1
jax: 0.10.0
libtpu: 0.0.40
codegen_flags: <defaults>
</compile_context>

<pallas_src>
import jax
import jax.numpy as jnp
from jax import lax
from jax.experimental import pallas as pl
from jax.experimental.pallas import tpu as pltpu


def _round_up(x, m):
    return ((x + m - 1) // m) * m


# ---------------------------------------------------------------------------
# Kernel
# ---------------------------------------------------------------------------
def matching_kernel(xv_ref, xl_ref, w1v_ref, w1l_ref, w2v_ref, w2l_ref, c_ref, out_ref):
    c = c_ref[...]                                    # (4, jemb_pad) f32 shifts

    # Layer 1 (Linear with folded BN scale) + shift + ReLU, per branch.
    hv = jnp.dot(xv_ref[...], w1v_ref[...], preferred_element_type=jnp.float32) + c[0:1, :]
    hl = jnp.dot(xl_ref[...], w1l_ref[...], preferred_element_type=jnp.float32) + c[1:2, :]
    hv = jnp.maximum(hv, 0.0)
    hl = jnp.maximum(hl, 0.0)
    # Dropout: identity (eval mode).

    # Layer 2 (Linear with folded BN scale) + shift, per branch.  bf16 MXU, f32 acc.
    ev = jnp.dot(hv.astype(w2v_ref.dtype), w2v_ref[...],
                 preferred_element_type=jnp.float32) + c[2:3, :]
    el = jnp.dot(hl.astype(w2l_ref.dtype), w2l_ref[...],
                 preferred_element_type=jnp.float32) + c[3:4, :]

    # Fused cosine-similarity epilogue (padded embedding columns are exactly zero).
    ss_v = jnp.sum(ev * ev, axis=1)                   # (TM,)
    ss_l = jnp.sum(el * el, axis=1)
    dp = jnp.sum(ev * el, axis=1)

    eps2 = jnp.float32(1e-24)                         # (torch F.normalize eps = 1e-12)^2
    inv_v = lax.rsqrt(jnp.maximum(ss_v, eps2))        # two rsqrt's: EUP slot, no under/overflow
    inv_l = lax.rsqrt(jnp.maximum(ss_l, eps2))
    out_ref[...] = (dp * inv_v * inv_l).reshape(1, -1)   # lane-dense (1, TM) store


# ---------------------------------------------------------------------------
# Wrapper
# ---------------------------------------------------------------------------
def matching_forward(visual_input, lang_input, w1v, w1l, w2v, w2l, c, *, tm=None):
    """visual_input (n, vis_dim), lang_input (n, lang_dim) -> (n, 1) cosine similarity."""
    n, vis_dim = visual_input.shape
    lang_dim = lang_input.shape[1]
    jp = w1v.shape[1]                                 # padded embedding width (mult of 128)

    # bf16 activations for the MXU (epilogue & accumulation stay f32 inside the kernel).
    xv = visual_input.astype(jnp.bfloat16)
    xl = lang_input.astype(jnp.bfloat16)

    if tm is None:
        # Small n: single full-extent block (no batch padding at all).
        # Large n: 256-row tiles -> >=2 grid steps (both v7x cores busy) and modest VMEM.
        tm = n if n <= 512 else 256
    n_pad = _round_up(n, tm)
    if n_pad != n:
        xv = jnp.pad(xv, ((0, n_pad - n), (0, 0)))
        xl = jnp.pad(xl, ((0, n_pad - n), (0, 0)))

    # Explicit VMEM budget: double-buffered x tiles + (worst case double-buffered)
    # resident weights + f32 intermediates, with headroom.  Capped below v7x's 64 MiB.
    w_bytes = (w1v.size + w1l.size + w2v.size + w2l.size) * w1v.dtype.itemsize
    est = (2 * tm * (vis_dim + lang_dim) * 2          # x tiles (bf16, double-buffered)
           + 2 * w_bytes                              # resident weights
           + 2 * c.size * 4                           # shifts
           + 2 * 4 * tm * jp * 4)                     # hv/hl/ev/el f32 intermediates
    vmem_limit = int(min(56 * 1024 * 1024, max(32 * 1024 * 1024, 2 * est)))

    # TODO(synk): for tiny-batch inference with very large W1, stream W1 over a trailing
    # "arbitrary" K grid axis with an f32 accumulator so the weight DMA overlaps compute
    # (matters most on v5e); and single-buffer the resident weights via
    # pipeline_mode=pl.Buffered(1) when VMEM-bound on v7x.
    out = pl.pallas_call(
        matching_kernel,
        out_shape=jax.ShapeDtypeStruct((1, n_pad), jnp.float32),
        grid=(n_pad // tm,),
        in_specs=[
            pl.BlockSpec((tm, vis_dim), lambda i: (i, 0)),    # batch-tiled visual input
            pl.BlockSpec((tm, lang_dim), lambda i: (i, 0)),   # batch-tiled language input
            pl.BlockSpec((vis_dim, jp), lambda i: (0, 0)),    # W1 visual (resident)
            pl.BlockSpec((lang_dim, jp), lambda i: (0, 0)),   # W1 language (resident)
            pl.BlockSpec((jp, jp), lambda i: (0, 0)),         # W2 visual (resident)
            pl.BlockSpec((jp, jp), lambda i: (0, 0)),         # W2 language (resident)
            pl.BlockSpec((4, jp), lambda i: (0, 0)),          # folded shifts (resident)
        ],
        out_specs=pl.BlockSpec((1, tm), lambda i: (0, i)),    # lane-dense output
        compiler_params=pltpu.CompilerParams(
            dimension_semantics=("parallel",),
            vmem_limit_bytes=vmem_limit),
    )(xv, xl, w1v, w1l, w2v, w2l, c)

    return out[0, :n].reshape(n, 1)


# ---------------------------------------------------------------------------
# Parameter preparation (done once, outside the kernel)
# ---------------------------------------------------------------------------
def fold_bn(bias, gamma, beta, running_mean, running_var, eps=1e-5):
    """Fold Linear bias + eval-mode BatchNorm1d into scale `a` and shift `c`."""
    scale = gamma / jnp.sqrt(running_var + eps)
    a = scale
    c = (bias - running_mean) * scale + beta
    return a.reshape(1, -1).astype(jnp.float32), c.reshape(1, -1).astype(jnp.float32)


def prepare_params(params, vis_dim, lang_dim, jemb_dim):
    """Fold the BN scale into the weights, pad the embedding dim to 128, cast to bf16."""
    (vw1, va1, vc1, vw2, va2, vc2,
     lw1, la1, lc1, lw2, la2, lc2) = params

    jp = _round_up(jemb_dim, 128)
    pc = jp - jemb_dim

    w1v = jnp.pad(vw1 * va1, ((0, 0), (0, pc))).astype(jnp.bfloat16)   # (vis_dim,  jp)
    w1l = jnp.pad(lw1 * la1, ((0, 0), (0, pc))).astype(jnp.bfloat16)   # (lang_dim, jp)
    w2v = jnp.pad(vw2 * va2, ((0, pc), (0, pc))).astype(jnp.bfloat16)  # (jp, jp)
    w2l = jnp.pad(lw2 * la2, ((0, pc), (0, pc))).astype(jnp.bfloat16)  # (jp, jp)

    # Shift rows: [layer1 visual, layer1 language, layer2 visual, layer2 language].
    c = jnp.zeros((4, jp), jnp.float32)
    c = c.at[0, :jemb_dim].set(vc1[0])
    c = c.at[1, :jemb_dim].set(lc1[0])
    c = c.at[2, :jemb_dim].set(vc2[0])
    c = c.at[3, :jemb_dim].set(lc2[0])
    return w1v, w1l, w2v, w2l, c


# ---------------------------------------------------------------------------
# Pure-JAX references and test-parameter generation
# ---------------------------------------------------------------------------
def reference_forward(visual_input, lang_input, params):
    """f32 reference of the original module semantics (folded eval-mode BN)."""
    (vw1, va1, vc1, vw2, va2, vc2,
     lw1, la1, lc1, lw2, la2, lc2) = params

    def branch(x, w1, a1, c1, w2, a2, c2):
        h = jnp.maximum(x @ w1 * a1 + c1, 0.0)
        return h @ w2 * a2 + c2

    ve = branch(visual_input, vw1, va1, vc1, vw2, va2, vc2)
    le = branch(lang_input, lw1, la1, lc1, lw2, la2, lc2)
    vn = ve / jnp.maximum(jnp.linalg.norm(ve, axis=1, keepdims=True), 1e-12)
    ln = le / jnp.maximum(jnp.linalg.norm(le, axis=1, keepdims=True), 1e-12)
    return jnp.sum(vn * ln, axis=1, keepdims=True)


def reference_forward_bf16(visual_input, lang_input, prepped):
    """Reference using the exact bf16-quantized weights/activations the kernel consumes."""
    w1v, w1l, w2v, w2l, c = prepped
    hi = lax.Precision.HIGHEST
    f32 = lambda a: a.astype(jnp.float32)
    xv = f32(visual_input.astype(jnp.bfloat16))
    xl = f32(lang_input.astype(jnp.bfloat16))
    hv = jnp.maximum(jnp.dot(xv, f32(w1v), precision=hi) + c[0:1], 0.0)
    hl = jnp.maximum(jnp.dot(xl, f32(w1l), precision=hi) + c[1:2], 0.0)
    ev = jnp.dot(f32(hv.astype(jnp.bfloat16)), f32(w2v), precision=hi) + c[2:3]
    el = jnp.dot(f32(hl.astype(jnp.bfloat16)), f32(w2l), precision=hi) + c[3:4]
    ss_v = jnp.sum(ev * ev, axis=1, keepdims=True)
    ss_l = jnp.sum(el * el, axis=1, keepdims=True)
    dp = jnp.sum(ev * el, axis=1, keepdims=True)
    eps2 = 1e-24
    return dp / (jnp.sqrt(jnp.maximum(ss_v, eps2)) * jnp.sqrt(jnp.maximum(ss_l, eps2)))


def make_params(key, vis_dim, lang_dim, jemb_dim):
    ks = jax.random.split(key, 16)

    def linear(kw, kb, din, dout):
        w = jax.random.normal(kw, (din, dout), jnp.float32) * 0.05
        b = jax.random.normal(kb, (dout,), jnp.float32) * 0.05
        return w, b

    def bn(kg, kb, dim):
        gamma = 1.0 + 0.1 * jax.random.normal(kg, (dim,), jnp.float32)
        beta = 0.1 * jax.random.normal(kb, (dim,), jnp.float32)
        rmean = 0.05 * jax.random.normal(kg, (dim,), jnp.float32)
        rvar = 1.0 + 0.1 * jax.random.uniform(kb, (dim,), jnp.float32)
        return gamma, beta, rmean, rvar

    # visual branch
    vw1, vb1 = linear(ks[0], ks[1], vis_dim, jemb_dim)
    vg1, vbe1, vm1, vv1 = bn(ks[2], ks[3], jemb_dim)
    vw2, vb2 = linear(ks[4], ks[5], jemb_dim, jemb_dim)
    vg2, vbe2, vm2, vv2 = bn(ks[6], ks[7], jemb_dim)
    va1, vc1 = fold_bn(vb1, vg1, vbe1, vm1, vv1)
    va2, vc2 = fold_bn(vb2, vg2, vbe2, vm2, vv2)

    # language branch
    lw1, lb1 = linear(ks[8], ks[9], lang_dim, jemb_dim)
    lg1, lbe1, lm1, lv1 = bn(ks[10], ks[11], jemb_dim)
    lw2, lb2 = linear(ks[12], ks[13], jemb_dim, jemb_dim)
    lg2, lbe2, lm2, lv2 = bn(ks[14], ks[15], jemb_dim)
    la1, lc1 = fold_bn(lb1, lg1, lbe1, lm1, lv1)
    la2, lc2 = fold_bn(lb2, lg2, lbe2, lm2, lv2)

    return (vw1, va1, vc1, vw2, va2, vc2,
            lw1, la1, lc1, lw2, la2, lc2)


if __name__ == "__main__":
    n, vis_dim, lang_dim, jemb_dim = 8, 32, 48, 32

    key = jax.random.PRNGKey(0)
    k_vis, k_lang, k_params = jax.random.split(key, 3)

    visual_input = jax.random.normal(k_vis, (n, vis_dim), jnp.float32)
    lang_input = jax.random.normal(k_lang, (n, lang_dim), jnp.float32)
    params = make_params(k_params, vis_dim, lang_dim, jemb_dim)

    # One-time parameter prep: fold BN, per-branch padded bf16 weights + f32 shifts.
    w1v, w1l, w2v, w2l, c = prepare_params(params, vis_dim, lang_dim, jemb_dim)

    out = matching_forward(visual_input, lang_input, w1v, w1l, w2v, w2l, c)
    out = jax.block_until_ready(out)

    assert out.shape == (n, 1), out.shape

    # Structural correctness: match the bf16-quantized reference tightly.
    ref_q = reference_forward_bf16(visual_input, lang_input, (w1v, w1l, w2v, w2l, c))
    assert jnp.allclose(out, ref_q, atol=1e-3, rtol=1e-3), (out, ref_q)

    # Module-semantics correctness: match the f32 reference within bf16-MXU precision.
    ref = reference_forward(visual_input, lang_input, params)
    assert jnp.allclose(out, ref, atol=5e-2, rtol=5e-2), (out, ref)

    print("KERNEL_OK")
</pallas_src>

<mosaic_0001>
module attributes {stable_mosaic.version = 11 : i64} {
  func.func @matching_kernel(%arg0: i32, %arg1: memref<8x32xbf16, #tpu.memory_space<vmem>>, %arg2: memref<8x48xbf16, #tpu.memory_space<vmem>>, %arg3: memref<32x128xbf16, #tpu.memory_space<vmem>>, %arg4: memref<48x128xbf16, #tpu.memory_space<vmem>>, %arg5: memref<128x128xbf16, #tpu.memory_space<vmem>>, %arg6: memref<128x128xbf16, #tpu.memory_space<vmem>>, %arg7: memref<4x128xf32, #tpu.memory_space<vmem>>, %arg8: memref<1x8xf32, #tpu.memory_space<vmem>>) attributes {dimension_semantics = [#tpu.dimension_semantics<parallel>], iteration_bounds = array<i64: 1>, scalar_prefetch = 0 : i64, scratch_operands = 0 : i64, tpu.core_type = #tpu.core_type<tc>, window_params = [{transform_indices = @transform_0, window_bounds = array<i64: 8, 32>}, {transform_indices = @transform_1, window_bounds = array<i64: 8, 48>}, {pipeline_mode = #tpu.pipeline_mode<synchronous>, transform_indices = @transform_2, window_bounds = array<i64: 32, 128>}, {pipeline_mode = #tpu.pipeline_mode<synchronous>, transform_indices = @transform_3, window_bounds = array<i64: 48, 128>}, {pipeline_mode = #tpu.pipeline_mode<synchronous>, transform_indices = @transform_4, window_bounds = array<i64: 128, 128>}, {pipeline_mode = #tpu.pipeline_mode<synchronous>, transform_indices = @transform_5, window_bounds = array<i64: 128, 128>}, {pipeline_mode = #tpu.pipeline_mode<synchronous>, transform_indices = @transform_6, window_bounds = array<i64: 4, 128>}, {transform_indices = @transform_7, window_bounds = array<i64: 1, 8>}]} {
    %c0 = arith.constant 0 : index
    %c0_0 = arith.constant 0 : index
    %0 = vector.load %arg7[%c0, %c0_0] : memref<4x128xf32, #tpu.memory_space<vmem>>, vector<4x128xf32>
    %c0_1 = arith.constant 0 : index
    %c0_2 = arith.constant 0 : index
    %1 = vector.load %arg1[%c0_1, %c0_2] : memref<8x32xbf16, #tpu.memory_space<vmem>>, vector<8x32xbf16>
    %c0_3 = arith.constant 0 : index
    %c0_4 = arith.constant 0 : index
    %2 = vector.load %arg3[%c0_3, %c0_4] : memref<32x128xbf16, #tpu.memory_space<vmem>>, vector<32x128xbf16>
    %cst = arith.constant dense<0.000000e+00> : vector<8x128xf32>
    %3 = tpu.matmul %1, %2, %cst {dimension_numbers = #tpu.dot_dimension_numbers<[1], [0], [0], [1], [0, 0, 1, 1], [], []>} : vector<8x32xbf16>, vector<32x128xbf16>, vector<8x128xf32> -> vector<8x128xf32>
    %4 = vector.extract_strided_slice %0 {offsets = [0, 0], sizes = [1, 128], strides = [1, 1]} : vector<4x128xf32> to vector<1x128xf32>
    %5 = vector.broadcast %4 : vector<1x128xf32> to vector<8x128xf32>
    %6 = arith.addf %3, %5 : vector<8x128xf32>
    %c0_5 = arith.constant 0 : index
    %c0_6 = arith.constant 0 : index
    %7 = vector.load %arg2[%c0_5, %c0_6] : memref<8x48xbf16, #tpu.memory_space<vmem>>, vector<8x48xbf16>
    %c0_7 = arith.constant 0 : index
    %c0_8 = arith.constant 0 : index
    %8 = vector.load %arg4[%c0_7, %c0_8] : memref<48x128xbf16, #tpu.memory_space<vmem>>, vector<48x128xbf16>
    %cst_9 = arith.constant dense<0.000000e+00> : vector<8x128xf32>
    %9 = tpu.matmul %7, %8, %cst_9 {dimension_numbers = #tpu.dot_dimension_numbers<[1], [0], [0], [1], [0, 0, 1, 1], [], []>} : vector<8x48xbf16>, vector<48x128xbf16>, vector<8x128xf32> -> vector<8x128xf32>
    %10 = vector.extract_strided_slice %0 {offsets = [1, 0], sizes = [1, 128], strides = [1, 1]} : vector<4x128xf32> to vector<1x128xf32>
    %11 = vector.broadcast %10 : vector<1x128xf32> to vector<8x128xf32>
    %12 = arith.addf %9, %11 : vector<8x128xf32>
    %cst_10 = arith.constant 0.000000e+00 : f32
    %13 = vector.broadcast %cst_10 : f32 to vector<8x128xf32>
    %14 = arith.maximumf %6, %13 : vector<8x128xf32>
    %cst_11 = arith.constant 0.000000e+00 : f32
    %15 = vector.broadcast %cst_11 : f32 to vector<8x128xf32>
    %16 = arith.maximumf %12, %15 : vector<8x128xf32>
    %17 = arith.truncf %14 : vector<8x128xf32> to vector<8x128xbf16>
    %c0_12 = arith.constant 0 : index
    %c0_13 = arith.constant 0 : index
    %18 = vector.load %arg5[%c0_12, %c0_13] : memref<128x128xbf16, #tpu.memory_space<vmem>>, vector<128x128xbf16>
    %cst_14 = arith.constant dense<0.000000e+00> : vector<8x128xf32>
    %19 = tpu.matmul %17, %18, %cst_14 {dimension_numbers = #tpu.dot_dimension_numbers<[1], [0], [0], [1], [0, 0, 1, 1], [], []>} : vector<8x128xbf16>, vector<128x128xbf16>, vector<8x128xf32> -> vector<8x128xf32>
    %20 = vector.extract_strided_slice %0 {offsets = [2, 0], sizes = [1, 128], strides = [1, 1]} : vector<4x128xf32> to vector<1x128xf32>
    %21 = vector.broadcast %20 : vector<1x128xf32> to vector<8x128xf32>
    %22 = arith.addf %19, %21 : vector<8x128xf32>
    %23 = arith.truncf %16 : vector<8x128xf32> to vector<8x128xbf16>
    %c0_15 = arith.constant 0 : index
    %c0_16 = arith.constant 0 : index
    %24 = vector.load %arg6[%c0_15, %c0_16] : memref<128x128xbf16, #tpu.memory_space<vmem>>, vector<128x128xbf16>
    %cst_17 = arith.constant dense<0.000000e+00> : vector<8x128xf32>
    %25 = tpu.matmul %23, %24, %cst_17 {dimension_numbers = #tpu.dot_dimension_numbers<[1], [0], [0], [1], [0, 0, 1, 1], [], []>} : vector<8x128xbf16>, vector<128x128xbf16>, vector<8x128xf32> -> vector<8x128xf32>
    %26 = vector.extract_strided_slice %0 {offsets = [3, 0], sizes = [1, 128], strides = [1, 1]} : vector<4x128xf32> to vector<1x128xf32>
    %27 = vector.broadcast %26 : vector<1x128xf32> to vector<8x128xf32>
    %28 = arith.addf %25, %27 : vector<8x128xf32>
    %29 = arith.mulf %22, %22 : vector<8x128xf32>
    %cst_18 = arith.constant dense<0.000000e+00> : vector<8xf32>
    %30 = vector.multi_reduction <add>, %29, %cst_18 [1] : vector<8x128xf32> to vector<8xf32>
    %31 = arith.mulf %28, %28 : vector<8x128xf32>
    %cst_19 = arith.constant dense<0.000000e+00> : vector<8xf32>
    %32 = vector.multi_reduction <add>, %31, %cst_19 [1] : vector<8x128xf32> to vector<8xf32>
    %33 = arith.mulf %22, %28 : vector<8x128xf32>
    %cst_20 = arith.constant dense<0.000000e+00> : vector<8xf32>
    %34 = vector.multi_reduction <add>, %33, %cst_20 [1] : vector<8x128xf32> to vector<8xf32>
    %cst_21 = arith.constant 1.000000e-24 : f32
    %35 = vector.broadcast %cst_21 : f32 to vector<8xf32>
    %36 = arith.maximumf %30, %35 : vector<8xf32>
    %37 = math.rsqrt %36 : vector<8xf32>
    %cst_22 = arith.constant 1.000000e-24 : f32
    %38 = vector.broadcast %cst_22 : f32 to vector<8xf32>
    %39 = arith.maximumf %32, %38 : vector<8xf32>
    %40 = math.rsqrt %39 : vector<8xf32>
    %41 = arith.mulf %34, %37 : vector<8xf32>
    %42 = arith.mulf %41, %40 : vector<8xf32>
    %43 = vector.shape_cast %42 : vector<8xf32> to vector<1x8xf32>
    %c0_23 = arith.constant 0 : index
    %c0_24 = arith.constant 0 : index
    %44 = vector.load %arg8[%c0_23, %c0_24] : memref<1x8xf32, #tpu.memory_space<vmem>>, vector<1x8xf32>
    tpu.vector_store %arg8[%c0_23, %c0_24], %43 {strides = array<i32>} : memref<1x8xf32, #tpu.memory_space<vmem>>, vector<1x8xf32>,
    return
  }
  func.func @transform_0(%arg0: i32) -> (i32, i32) {
    %c0_i32 = arith.constant 0 : i32
    %c0_i32_0 = arith.constant 0 : i32
    return %arg0, %c0_i32 : i32, i32
  }
  func.func @transform_1(%arg0: i32) -> (i32, i32) {
    %c0_i32 = arith.constant 0 : i32
    %c0_i32_0 = arith.constant 0 : i32
    return %arg0, %c0_i32 : i32, i32
  }
  func.func @transform_2(%arg0: i32) -> (i32, i32) {
    %c0_i32 = arith.constant 0 : i32
    %c0_i32_0 = arith.constant 0 : i32
    %c0_i32_1 = arith.constant 0 : i32
    return %c0_i32, %c0_i32_0 : i32, i32
  }
  func.func @transform_3(%arg0: i32) -> (i32, i32) {
    %c0_i32 = arith.constant 0 : i32
    %c0_i32_0 = arith.constant 0 : i32
    %c0_i32_1 = arith.constant 0 : i32
    return %c0_i32, %c0_i32_0 : i32, i32
  }
  func.func @transform_4(%arg0: i32) -> (i32, i32) {
    %c0_i32 = arith.constant 0 : i32
    %c0_i32_0 = arith.constant 0 : i32
    %c0_i32_1 = arith.constant 0 : i32
    return %c0_i32, %c0_i32_0 : i32, i32
  }
  func.func @transform_5(%arg0: i32) -> (i32, i32) {
    %c0_i32 = arith.constant 0 : i32
    %c0_i32_0 = arith.constant 0 : i32
    %c0_i32_1 = arith.constant 0 : i32
    return %c0_i32, %c0_i32_0 : i32, i32
  }
  func.func @transform_6(%arg0: i32) -> (i32, i32) {
    %c0_i32 = arith.constant 0 : i32
    %c0_i32_0 = arith.constant 0 : i32
    %c0_i32_1 = arith.constant 0 : i32
    return %c0_i32, %c0_i32_0 : i32, i32
  }
  func.func @transform_7(%arg0: i32) -> (i32, i32) {
    %c0_i32 = arith.constant 0 : i32
    %c0_i32_0 = arith.constant 0 : i32
    return %c0_i32, %arg0 : i32, i32
  }
}

</mosaic_0001>

<bundles_post_ra>
// kernel: tpu_custom_call.1
= control target key start
LH: loop header
LB: loop body
LE: loop exit
PB: predicated region body
PF: predicated region fallthrough
CT: control target
= control target key end

     0   :  { %12 = vsyncpa [#allocation3], 0  ;;  %s916_s0 = inlined_call_operand.hbm [shape: bf16[8,32], index: 0, kind: input, shape index: {}]   ;;  %s917_s1 = inlined_call_operand.hbm [shape: bf16[8,48], index: 1, kind: input, shape index: {}]   ;;  %s918_s2 = inlined_call_operand.hbm [shape: bf16[32,128], index: 2, kind: input, shape index: {}]   ;;  %s919_s3 = inlined_call_operand.hbm [shape: bf16[48,128], index: 3, kind: input, shape index: {}]   ;;  %s920_s4 = inlined_call_operand.hbm [shape: bf16[128,128], index: 4, kind: input, shape index: {}]   ;;  %s921_s5 = inlined_call_operand.hbm [shape: bf16[128,128], index: 5, kind: input, shape index: {}]   ;;  %s922_s6 = inlined_call_operand.vmem [shape: f32[4,128], index: 6, kind: input, shape index: {}]   ;;  %s923_s7 = inlined_call_operand.hbm [shape: f32[1,8], index: 7, kind: output, shape index: {}]  }
   0x1   :  { %13 = vsyncpa [#allocation6], 0 }
   0x2   :  { %14 = vsyncpa [#allocation9], 0 }
   0x3   :  { %15 = vsyncpa [#allocation12], 0 }
   0x4   :  { %16 = vsyncpa [#allocation4], 0  ;;  %s800_s24 = smov [#allocation5]  }
   0x5   :  { %s33_s25 = sshll.u32 %s800_s24, 4  ;;  %s34_s25 = int_to_ptr.vmem [resolvable:$true] %s33_s25 }
   0x6   :  { %s658_s26 = scalar_lea.vmem %s34_s25, 64  ;;  %p663_p1 = scmp.lt.s32.totalorder %s34_s25, %s34_s25 }
   0x7   :  { %p659_p0 = scmp.ne.s32.totalorder %s34_s25, %s658_s26  ;;  %p664_p2 = scmp.lt.s32.totalorder %s658_s26, %s658_s26 }
   0x9   :  { %p665_p3 = por %p664_p2, %p663_p1 }
   0xb   :  { %p666_p4 = pnand %p665_p3, %p659_p0 }
   0xd   :  { %669 = shalt.err (!%p666_p4)
}
   0xe   :  { %36 = dma.hbm_to_vmem [thread:$0]  %s917_s1, 64, %s34_s25, [#allocation6]  }
   0xf   :  { %s801_s29 = smov [#allocation8]   ;;  %s802_s8 = smov [#allocation2]  }
  0x10   :  { %s54_s30 = sshll.u32 %s801_s29, 4  ;;  %s23_s9 = sshll.u32 %s802_s8, 4  ;;  %s55_s30 = int_to_ptr.vmem [resolvable:$true] %s54_s30  ;;  %s24_s9 = int_to_ptr.vmem [resolvable:$true] %s23_s9 }
  0x11   :  { %s678_s10 = scalar_lea.vmem %s55_s30, 384  ;;  %p683_p6 = scmp.lt.s32.totalorder %s55_s30, %s55_s30 }
  0x12   :  { %p679_p5 = scmp.ne.s32.totalorder %s55_s30, %s678_s10  ;;  %p684_p7 = scmp.lt.s32.totalorder %s678_s10, %s678_s10 }
  0x14   :  { %p685_p8 = por %p684_p7, %p683_p6 }
  0x16   :  { %p686_p9 = pnand %p685_p8, %p679_p5 }
  0x18   :  { %689 = shalt.err (!%p686_p9)
}
  0x19   :  { %s803_s11 = smov 64   ;;  %s804_s12 = smov 4  }
  0x1a   :  { %60 = dma.hbm_to_vmem [thread:$0]  %s919_s3, 384, %s55_s30, [#allocation9], %s803_s11, %s803_s11, %s804_s12  }
  0x1b   :  { %s698_s1 = scalar_lea.vmem %s24_s9, 64  ;;  %p703_p11 = scmp.lt.s32.totalorder %s24_s9, %s24_s9 }
  0x1c   :  { %p699_p10 = scmp.ne.s32.totalorder %s24_s9, %s698_s1  ;;  %p704_p12 = scmp.lt.s32.totalorder %s698_s1, %s698_s1 }
  0x1e   :  { %p705_p13 = por %p704_p12, %p703_p11 }
  0x20   :  { %p706_p0 = pnand %p705_p13, %p699_p10 }
  0x22   :  { %709 = shalt.err (!%p706_p0)
}
  0x23   :  { %26 = dma.hbm_to_vmem [thread:$0]  %s916_s0, 64, %s24_s9, [#allocation3]  }
  0x24   :  { %s805_s17 = smov [#allocation7]   ;;  %s806_s19 = smov [#allocation10]  }
  0x25   :  { %s42_s18 = sshll.u32 %s805_s17, 4  ;;  %s66_s20 = sshll.u32 %s806_s19, 4  ;;  %s43_s18 = int_to_ptr.vmem [resolvable:$true] %s42_s18  ;;  %s67_s20 = int_to_ptr.vmem [resolvable:$true] %s66_s20 }
  0x26   :  { %s718_s21 = scalar_lea.vmem %s43_s18, 256  ;;  %p723_p2 = scmp.lt.s32.totalorder %s43_s18, %s43_s18 }
  0x27   :  { %p719_p1 = scmp.ne.s32.totalorder %s43_s18, %s718_s21  ;;  %p724_p3 = scmp.lt.s32.totalorder %s718_s21, %s718_s21 }
  0x29   :  { %p725_p4 = por %p724_p3, %p723_p2 }
  0x2b   :  { %p726_p5 = pnand %p725_p4, %p719_p1 }
  0x2d   :  { %729 = shalt.err (!%p726_p5)
}
  0x2e   :  { %48 = dma.hbm_to_vmem [thread:$0]  %s918_s2, 256, %s43_s18, [#allocation6], %s803_s11, %s803_s11, %s804_s12  }
  0x2f   :  { %s738_s0 = scalar_lea.vmem %s67_s20, 1024  ;;  %p743_p7 = scmp.lt.s32.totalorder %s67_s20, %s67_s20 }
  0x30   :  { %p739_p6 = scmp.ne.s32.totalorder %s67_s20, %s738_s0  ;;  %p744_p8 = scmp.lt.s32.totalorder %s738_s0, %s738_s0 }
  0x32   :  { %p745_p9 = por %p744_p8, %p743_p7 }
  0x34   :  { %p746_p10 = pnand %p745_p9, %p739_p6 }
  0x36   :  { %749 = shalt.err (!%p746_p10)
}
  0x37   :  { %72 = dma.hbm_to_vmem [thread:$0]  %s920_s4, 1024, %s67_s20, [#allocation9], %s803_s11, %s803_s11, %s804_s12  }
  0x38   :  { %s807_s25 = smov [#allocation11]  }
  0x39   :  { %s78_s26 = sshll.u32 %s807_s25, 4  ;;  %s79_s26 = int_to_ptr.vmem [resolvable:$true] %s78_s26 }
  0x3a   :  { %s758_s27 = scalar_lea.vmem %s79_s26, 1024  ;;  %p763_p12 = scmp.lt.s32.totalorder %s79_s26, %s79_s26 }
  0x3b   :  { %p759_p11 = scmp.ne.s32.totalorder %s79_s26, %s758_s27  ;;  %p764_p13 = scmp.lt.s32.totalorder %s758_s27, %s758_s27 }
  0x3d   :  { %p765_p0 = por %p764_p13, %p763_p12 }
  0x3f   :  { %p766_p1 = pnand %p765_p0, %p759_p11 }
  0x41   :  { %769 = shalt.err (!%p766_p1)
}
  0x42   :  { %84 = dma.hbm_to_vmem [thread:$0]  %s921_s5, 1024, %s79_s26, [#allocation12], %s803_s11, %s803_s11, %s804_s12  }
  0x43   :  { %790 = dma.done.wait [#allocation3], 64  }
  0x44   :  { %791 = vsyncadd [#allocation3], 4294967232 }
  0x45   :  { %792 = dma.done.wait [#allocation6], 320  }
  0x46   :  { %793 = vsyncadd [#allocation6], 4294966976 }
  0x47   :  { %794 = dma.done.wait [#allocation9], 1408  }
  0x48   :  { %795 = vsyncadd [#allocation9], 4294965888 }
  0x49   :  { %796 = dma.done.wait [#allocation12], 1024  }
  0x4a   :  { %797 = vsyncadd [#allocation12], 4294966272  ;;  %v808_v0 = vmov 0.0   ;;  %vm809_vm0 = vmmov 0   ;;  %v625_v1 = vld [vmem:[#allocation7 + $0x8] sm:$0xff]   ;;  %v626_v2 = vld [vmem:[#allocation8 + $0x10] sm:$0xff]   ;;  %v112_v24 = vlaneseq }
  0x4b   :  { %556 = vmatprep.subr.bf16.mxu0 %v808_v0  ;;  %564 = vmatprep.subr.bf16.mxu1 %v808_v0  ;;  %v627_v3 = vld [vmem:[#allocation7] sm:$0xff]   ;;  %v628_v4 = vld [vmem:[#allocation8 + $0x8] sm:$0xff]   ;;  %vm128_vm1 = vcmask 261120   ;;  %v629_v7 = vld [vmem:[#allocation8] sm:$0xff]   ;;  %vm201_vm2 = vcmask 392192   ;;  %vm488_vm3 = vcmask 57344  }
  0x4c   :  { %560 = vmatprep.mubr.msk.bf16.mxu0 %vm809_vm0, %v808_v0  ;;  %570 = vmatprep.mubr.msk.bf16.mxu1 %vm809_vm0, %v808_v0  ;;  %v107_v5 = vld [vmem:[#allocation2] sm:$0xf]  ;;  %v630_v6 = vld [vmem:[#allocation10 + $0x38] sm:$0xff]   ;;  %v172_v8 = vld [vmem:[#allocation5] sm:$0xf]  ;;  %v113_v25 = vshrl.u32 %v112_v24, 7 }
  0x4d   :  { %557 = vmatpush3.bf16.msra.mxu0 %v625_v1  ;;  %565 = vmatpush3.bf16.msra.mxu1 %v626_v2  ;;  %v631_v9 = vld [vmem:[#allocation10 + $0x30] sm:$0xff]   ;;  %v632_v10 = vld [vmem:[#allocation11 + $0x38] sm:$0xff]   ;;  %v633_v11 = vld [vmem:[#allocation10 + $0x28] sm:$0xff]   ;;  %v482_v2 = vand.u32 127, %v112_v24 }
  0x4e   :  { %558 = vmatprep.subr.bf16.mxu0 %v808_v0  ;;  %566 = vmatprep.subr.bf16.mxu1 %v808_v0  ;;  %v634_v12 = vld [vmem:[#allocation11 + $0x30] sm:$0xff]   ;;  %v635_v13 = vld [vmem:[#allocation10 + $0x20] sm:$0xff]   ;;  %v636_v14 = vld [vmem:[#allocation11 + $0x28] sm:$0xff]   ;;  %v114_v26 = vsub.s32 0, %v113_v25  ;;  %v181_v29 = vsub.s32 1, %v113_v25  ;;  %v266_v45 = vsub.s32 2, %v113_v25 }
  0x4f   :  { %v637_v15 = vld [vmem:[#allocation10 + $0x18] sm:$0xff]   ;;  %v638_v16 = vld [vmem:[#allocation11 + $0x20] sm:$0xff]   ;;  %v639_v17 = vld [vmem:[#allocation10 + $0x10] sm:$0xff]   ;;  %v375_v47 = vsub.s32 3, %v113_v25 }
  0x50   :  { %v640_v18 = vld [vmem:[#allocation11 + $0x18] sm:$0xff]   ;;  %v641_v19 = vld [vmem:[#allocation10 + $0x8] sm:$0xff]   ;;  %v642_v20 = vld [vmem:[#allocation11 + $0x10] sm:$0xff]  }
  0x51   :  { %559 = vmatpush3.bf16.msra.mxu0 %v627_v3  ;;  %567 = vmatpush3.bf16.msra.mxu1 %v628_v4  ;;  %v643_v21 = vld [vmem:[#allocation10] sm:$0xff]   ;;  %v644_v22 = vld [vmem:[#allocation11 + $0x8] sm:$0xff]   ;;  %v106_v27 = vld [vmem:[%s922_s6] sm:$0xf]  ;;  %s810_s6 = smov [#allocation13]  }
  0x52   :  { %574 = vmatprep.subr.bf16.mxu0 %v808_v0  ;;  %568 = vmatprep.subr.bf16.mxu1 %v808_v0  ;;  %v645_v23 = vld [vmem:[#allocation11] sm:$0xff]   ;;  %v115_v28 = vrot.slane %v106_v27, %v114_v26  ;;  %v182_v33 = vrot.slane %v106_v27, %v181_v29  ;;  %v267_v46 = vrot.slane %v106_v27, %v266_v45  ;;  %s496_s29 = sshll.u32 %s810_s6, 4  ;;  %s497_s29 = int_to_ptr.vmem [resolvable:$true] %s496_s29 }
  0x53   :  { %v376_v51 = vrot.slane %v106_v27, %v375_v47  ;;  %s770_s30 = scalar_lea.vmem %s497_s29, 16  ;;  %s774_s8 = scalar_lea.vmem %s497_s29, 32 }
  0x54   :  { %561 = vmatmul.mubr.msk.bf16.vlgmr.msra.gmra.mxu0 %vm128_vm1, %v107_v5  ;;  %p771_p2 = scmp.ne.s32.totalorder %s497_s29, %s770_s30  ;;  %p775_p3 = scmp.lt.s32.totalorder %s497_s29, %s497_s29 }
  0x55   :  { %575 = vmatpush3.bf16.msra.mxu0 %v630_v6  ;;  %590 = vmatprep.mubr.msk.bf16.mxu0 %vm809_vm0, %v808_v0  ;;  %v485_v6 = vsub.s32 %v482_v2, %v113_v25  ;;  %p776_p4 = scmp.lt.s32.totalorder %s774_s8, %s770_s30 }
  0x56   :  { %569 = vmatpush3.bf16.msra.mxu1 %v629_v7  ;;  %576 = vmatprep.subr.bf16.mxu0 %v808_v0 }
  0x57   :  { %594 = vmatprep.subr.bf16.mxu1 %v808_v0  ;;  %p777_p5 = por %p776_p4, %p775_p3 }
  0x59   :  { %571 = vmatmul.mubr.msk.bf16.vlgmr.msra.gmra.mxu1 %vm201_vm2, %v172_v8  ;;  %577 = vmatpush3.bf16.msra.mxu0 %v631_v9  ;;  %p778_p6 = pnand %p777_p5, %p771_p2 }
  0x5a   :  { %595 = vmatpush3.bf16.msra.mxu1 %v632_v10  ;;  %578 = vmatprep.subr.bf16.mxu0 %v808_v0 }
  0x5b   :  { %596 = vmatprep.subr.bf16.mxu1 %v808_v0  ;;  %610 = vmatprep.mubr.msk.bf16.mxu1 %vm809_vm0, %v808_v0 }
  0x5d   :  { %579 = vmatpush3.bf16.msra.mxu0 %v633_v11 }
  0x5e   :  { %597 = vmatpush3.bf16.msra.mxu1 %v634_v12  ;;  %580 = vmatprep.subr.bf16.mxu0 %v808_v0 }
  0x5f   :  { %598 = vmatprep.subr.bf16.mxu1 %v808_v0 }
  0x61   :  { %581 = vmatpush3.bf16.msra.mxu0 %v635_v13 }
  0x62   :  { %599 = vmatpush3.bf16.msra.mxu1 %v636_v14  ;;  %582 = vmatprep.subr.bf16.mxu0 %v808_v0 }
  0x63   :  { %600 = vmatprep.subr.bf16.mxu1 %v808_v0 }
  0x65   :  { %583 = vmatpush3.bf16.msra.mxu0 %v637_v15 }
  0x66   :  { %601 = vmatpush3.bf16.msra.mxu1 %v638_v16  ;;  %584 = vmatprep.subr.bf16.mxu0 %v808_v0 }
  0x67   :  { %602 = vmatprep.subr.bf16.mxu1 %v808_v0 }
  0x69   :  { %585 = vmatpush3.bf16.msra.mxu0 %v639_v17 }
  0x6a   :  { %603 = vmatpush3.bf16.msra.mxu1 %v640_v18  ;;  %586 = vmatprep.subr.bf16.mxu0 %v808_v0 }
  0x6b   :  { %604 = vmatprep.subr.bf16.mxu1 %v808_v0 }
  0x6d   :  { %587 = vmatpush3.bf16.msra.mxu0 %v641_v19 }
  0x6e   :  { %605 = vmatpush3.bf16.msra.mxu1 %v642_v20  ;;  %588 = vmatprep.subr.bf16.mxu0 %v808_v0 }
  0x6f   :  { %606 = vmatprep.subr.bf16.mxu1 %v808_v0 }
  0x71   :  { %589 = vmatpush3.bf16.msra.mxu0 %v643_v21 }
  0x72   :  { %607 = vmatpush3.bf16.msra.mxu1 %v644_v22 }
  0x73   :  { %608 = vmatprep.subr.bf16.mxu1 %v808_v0 }
  0x76   :  { %609 = vmatpush3.bf16.msra.mxu1 %v645_v23 }
 0x114   :  { %v166_v30 = vpop.f32.mrf.mxu0 }
 0x115   :  { %v167_v31 = vadd.f32 %v166_v30, %v115_v28 }
 0x116   :  { %v562_v32 = vpop.f32.mrf.mxu0 }
 0x117   :  { %v245_v34 = vmax.f32 %v167_v31, 0.0 }
 0x118   :  { %v169_v35 = vpop.f32.mrf.mxu0 }
 0x119   :  { %v247_v36 = vpack.c.bf16 %v245_v34, %v245_v34  ;;  %v239_v37 = vpop.f32.mrf.mxu1 }
 0x11a   :  { %v240_v38 = vadd.f32 %v239_v37, %v182_v33  ;;  %v563_v39 = vpop.f32.mrf.mxu0 }
 0x11b   :  { %v572_v40 = vpop.f32.mrf.mxu1  ;;  %591 = vmatmul.mubr.bf16.vlgmr.msra.gmra.mxu0 %v247_v36 }
 0x11c   :  { %v246_v41 = vmax.f32 %v240_v38, 0.0 }
 0x11d   :  { %v242_v42 = vpop.f32.mrf.mxu1 }
 0x11e   :  { %v356_v43 = vpack.c.bf16 %v246_v41, %v246_v41 }
 0x11f   :  { %v573_v44 = vpop.f32.mrf.mxu1 }
 0x120   :  { %611 = vmatmul.mubr.bf16.vlgmr.msra.gmra.mxu1 %v356_v43 }
 0x1db   :  { %v350_v48 = vpop.f32.mrf.mxu0 }
 0x1dc   :  { %v351_v49 = vadd.f32 %v350_v48, %v267_v46 }
 0x1dd   :  { %v592_v50 = vpop.f32.mrf.mxu0 }
 0x1de   :  { %v465_v52 = vmul.f32 %v351_v49, %v351_v49 }
 0x1df   :  { %v353_v53 = vpop.f32.mrf.mxu0 }
 0x1e0   :  { %v459_v54 = vpop.f32.mrf.mxu1  ;;  %466 = vadd.xlane.f32.xlu0 %v465_v52 }
 0x1e1   :  { %v460_v55 = vadd.f32 %v459_v54, %v376_v51  ;;  %v593_v56 = vpop.f32.mrf.mxu0 }
 0x1e2   :  { %v612_v57 = vpop.f32.mrf.mxu1 }
 0x1e3   :  { %v471_v58 = vmul.f32 %v460_v55, %v351_v49  ;;  %v468_v59 = vmul.f32 %v460_v55, %v460_v55 }
 0x1e4   :  { %v462_v60 = vpop.f32.mrf.mxu1 }
 0x1e5   :  { %472 = vadd.xlane.f32.xlu1 %v471_v58  ;;  %469 = vadd.xlane.f32.xlu0 %v468_v59 }
 0x1e6   :  { %v613_v61 = vpop.f32.mrf.mxu1 }
 0x269   :  { %v467_v62 = vpop.xlane.xlu0 %466 }
 0x26a   :  { %v474_v63 = vmax.f32 %v467_v62, 1e-24 }
 0x26c   :  { %646 = vrsqrt.f32 %v474_v63 }
 0x26e   :  { %v470_v0 = vpop.xlane.xlu0 %469  ;;  %v473_v4 = vpop.xlane.xlu1 %472 }
 0x26f   :  { %v476_v1 = vmax.f32 %v470_v0, 1e-24 }
 0x271   :  { %648 = vrsqrt.f32 %v476_v1 }
 0x279   :  { %v647_v3 = vpop.eup %646 }
 0x27a   :  { %v478_v5 = vmul.f32 %v647_v3, %v473_v4 }
 0x27e   :  { %v649_v7 = vpop.eup %648 }
 0x27f   :  { %v479_v8 = vmul.f32 %v649_v7, %v478_v5 }
 0x281   :  { %v486_v9 = vrot.slane %v479_v8, %v485_v6 }
 0x283   :  { %489 = vst.msk [vmem:[#allocation13] sm:$0x1] %vm488_vm3, %v486_v9 }
 0x284   :  { %781 = shalt.err (!%p778_p6)
}
 0x285   :  { %499 = dma.vmem_to_hbm [thread:$0]  %s497_s29, 16, %s923_s7, [#allocation4]  }
 0x286   :  { %798 = dma.done.wait [#allocation4], 16  }
 0x287   :  { %799 = vsyncadd [#allocation4], 4294967280 }
 0x288   :  { %503 = vsyncpa [#allocation3], 1 }
 0x289   :  { %504 = vsyncpa [#allocation6], 1 }
 0x28a   :  { %505 = vsyncpa [#allocation9], 1 }
 0x28b   :  { %506 = vsyncpa [#allocation12], 1 }
 0x28c   :  { %507 = vsyncpa [#allocation4], 1 }

</bundles_post_ra>
